<compile_context>
chip_gen: v6e
topology: v6e:2x2x1
jax: 0.10.0
libtpu: 0.0.40
codegen_flags: <defaults>
</compile_context>

<pallas_src>
import functools

import jax
import jax.numpy as jnp
from jax import lax
from jax.experimental import pallas as pl
from jax.experimental.pallas import tpu as pltpu

LN_EPS = 1e-5


def fc_kernel(x_ref, w1_ref, b1_ref, w2_ref, b2_ref, g_ref, beta_ref,
              w3_ref, b3_ref, o_ref):
    # Layer 1: Linear -> ReLU. x arrives bf16 (cast in wrapper), f32 accumulate.
    h = jnp.dot(x_ref[...], w1_ref[...],
                preferred_element_type=jnp.float32) + b1_ref[...]
    h = jnp.maximum(h, 0.0)

    # Layer 2: Linear -> LayerNorm -> Tanh
    h = jnp.dot(h.astype(jnp.bfloat16), w2_ref[...],
                preferred_element_type=jnp.float32) + b2_ref[...]
    # Fused LN statistics (single pass, f32): biased variance = E[h^2]-E[h]^2,
    # clamped at 0 to guard against cancellation, matching nn.LayerNorm.
    mu = jnp.mean(h, axis=-1, keepdims=True)
    s2 = jnp.mean(h * h, axis=-1, keepdims=True)
    var = jnp.maximum(s2 - mu * mu, 0.0)
    h = (h - mu) * lax.rsqrt(var + LN_EPS)
    # Affine in f32, tanh in bf16; the result feeds the bf16 MXU dot directly.
    h = jnp.tanh((h * g_ref[...] + beta_ref[...]).astype(jnp.bfloat16))

    # Layer 3: Linear (LINEAR activation = identity)
    o_ref[...] = (jnp.dot(h, w3_ref[...],
                          preferred_element_type=jnp.float32)
                  + b3_ref[...]).astype(o_ref.dtype)


def _round_up(n, m):
    return ((n + m - 1) // m) * m


@functools.partial(jax.jit, static_argnames=("block_rows",))
def fully_connected_forward(x, params, block_rows=2048):
    """3-layer MLP forward as one batch-tiled Pallas kernel.

    x: (B, input_dim), any float dtype (truncated to bf16 for the MXU).
    params: pre-transposed weights (in, out) in bf16 plus f32 biases /
    LayerNorm gamma,beta as (1, D) rows.  Output: (B, out_dim) f32.
    """
    w1, b1, w2, b2, g, beta, w3, b3 = params
    B, d_in = x.shape
    h1 = w1.shape[1]
    h2 = w2.shape[1]
    out_dim = w3.shape[1]

    # The first dot truncates x to bf16 anyway; streaming bf16 halves the x DMA.
    if x.dtype != jnp.bfloat16:
        x = x.astype(jnp.bfloat16)

    # Batch tile: multiple of 8 sublanes, capped at block_rows. No host-side
    # padding: Pallas clips the ragged last block's writeback.
    tm = min(_round_up(block_rows, 8), _round_up(B, 8))
    grid = (pl.cdiv(B, tm),)

    # Constant index_maps keep all parameters VMEM-resident across grid steps;
    # only the x tile and out tile stream (double-buffered by Pallas).
    const = lambda i: (0, 0)
    in_specs = [
        pl.BlockSpec((tm, d_in), lambda i: (i, 0)),   # x  (streamed, bf16)
        pl.BlockSpec((d_in, h1), const),              # w1 (resident)
        pl.BlockSpec((1, h1), const),                 # b1
        pl.BlockSpec((h1, h2), const),                # w2
        pl.BlockSpec((1, h2), const),                 # b2
        pl.BlockSpec((1, h2), const),                 # ln gamma
        pl.BlockSpec((1, h2), const),                 # ln beta
        pl.BlockSpec((h2, out_dim), const),           # w3
        pl.BlockSpec((1, out_dim), const),            # b3
    ]
    out_spec = pl.BlockSpec((tm, out_dim), lambda i: (i, 0))

    param_bytes = sum(int(p.size) * p.dtype.itemsize for p in params)
    cost = pl.CostEstimate(
        flops=2 * B * (d_in * h1 + h1 * h2 + h2 * out_dim),
        transcendentals=B * (h2 + 1),                 # tanh per h2 elem + rsqrt
        bytes_accessed=B * (d_in * 2 + out_dim * 4) + param_bytes,
    )

    out = pl.pallas_call(
        fc_kernel,
        out_shape=jax.ShapeDtypeStruct((B, out_dim), jnp.float32),
        grid=grid,
        in_specs=in_specs,
        out_specs=out_spec,
        compiler_params=pltpu.CompilerParams(
            dimension_semantics=("parallel",),
            vmem_limit_bytes=32 * 1024 * 1024),
        cost_estimate=cost,
    )(x, w1, b1, w2, b2, g, beta, w3, b3)

    return out


def init_params(key, input_dim, layer_dims):
    """Deterministic init mimicking nn.Linear default (uniform +/- 1/sqrt(fan_in)).

    Weights returned already transposed to (in, out), in f32.
    """
    params = []
    d_in = input_dim
    for d_out in layer_dims:
        kw, kb, key = jax.random.split(key, 3)
        bound = 1.0 / jnp.sqrt(d_in)
        w = jax.random.uniform(kw, (d_in, d_out), jnp.float32, -bound, bound)
        b = jax.random.uniform(kb, (1, d_out), jnp.float32, -bound, bound)
        params.append((w, b))
        d_in = d_out
    return params


def reference_forward(x, lin_params, ln_params):
    """Plain-JAX f32 reference of the same forward pass."""
    (w1, b1), (w2, b2), (w3, b3) = lin_params
    g, beta = ln_params
    h = jnp.maximum(x @ w1 + b1, 0.0)
    h = h @ w2 + b2
    mu = jnp.mean(h, axis=-1, keepdims=True)
    var = jnp.mean((h - mu) ** 2, axis=-1, keepdims=True)
    h = jnp.tanh((h - mu) / jnp.sqrt(var + LN_EPS) * g + beta)
    return h @ w3 + b3


if __name__ == "__main__":
    key = jax.random.PRNGKey(0)

    B = 24
    input_dim = 32
    layer_dims = [64, 64, 16]

    kx, kp = jax.random.split(key)
    x = jax.random.normal(kx, (B, input_dim), jnp.float32)

    lin_params = init_params(kp, input_dim, layer_dims)
    (w1, b1), (w2, b2), (w3, b3) = lin_params
    # LayerNorm params for layer 2 (default init: gamma=1, beta=0)
    ln_gamma = jnp.ones((1, layer_dims[1]), jnp.float32)
    ln_beta = jnp.zeros((1, layer_dims[1]), jnp.float32)

    # Ship weights bf16 (MXU-native); biases / LN params stay f32.
    params = (w1.astype(jnp.bfloat16), b1,
              w2.astype(jnp.bfloat16), b2,
              ln_gamma, ln_beta,
              w3.astype(jnp.bfloat16), b3)

    ref = reference_forward(x, lin_params, (ln_gamma, ln_beta))

    # Small block_rows just to exercise the multi-step grid (grid=(3,)) with
    # VMEM-resident params; real workloads use the default block_rows=2048.
    out_a = jax.block_until_ready(
        fully_connected_forward(x, params, block_rows=8))
    # grid=(2,) with a ragged last block (rows 16..31 declared, 16..23 valid):
    # exercises the pad-free cdiv path with clipped writeback.
    out_b = jax.block_until_ready(
        fully_connected_forward(x, params, block_rows=16))

    for out in (out_a, out_b):
        assert out.shape == (B, layer_dims[-1])
        # bf16 matmul operands / bf16 tanh with f32 accumulation -> loosened
        # tolerance (intentional precision trade vs. the f32 PyTorch model).
        assert jnp.allclose(out, ref, atol=2e-2, rtol=2e-2), "mismatch vs reference"

    print("KERNEL_OK")
</pallas_src>

<mosaic_0001>
module attributes {stable_mosaic.version = 11 : i64} {
  func.func @fc_kernel(%arg0: i32, %arg1: memref<8x32xbf16, #tpu.memory_space<vmem>>, %arg2: memref<32x64xbf16, #tpu.memory_space<vmem>>, %arg3: memref<1x64xf32, #tpu.memory_space<vmem>>, %arg4: memref<64x64xbf16, #tpu.memory_space<vmem>>, %arg5: memref<1x64xf32, #tpu.memory_space<vmem>>, %arg6: memref<1x64xf32, #tpu.memory_space<vmem>>, %arg7: memref<1x64xf32, #tpu.memory_space<vmem>>, %arg8: memref<64x16xbf16, #tpu.memory_space<vmem>>, %arg9: memref<1x16xf32, #tpu.memory_space<vmem>>, %arg10: memref<8x16xf32, #tpu.memory_space<vmem>>) attributes {dimension_semantics = [#tpu.dimension_semantics<parallel>], iteration_bounds = array<i64: 3>, scalar_prefetch = 0 : i64, scratch_operands = 0 : i64, tpu.core_type = #tpu.core_type<tc>, window_params = [{transform_indices = @transform_0, window_bounds = array<i64: 8, 32>}, {pipeline_mode = #tpu.pipeline_mode<synchronous>, transform_indices = @transform_1, window_bounds = array<i64: 32, 64>}, {pipeline_mode = #tpu.pipeline_mode<synchronous>, transform_indices = @transform_2, window_bounds = array<i64: 1, 64>}, {pipeline_mode = #tpu.pipeline_mode<synchronous>, transform_indices = @transform_3, window_bounds = array<i64: 64, 64>}, {pipeline_mode = #tpu.pipeline_mode<synchronous>, transform_indices = @transform_4, window_bounds = array<i64: 1, 64>}, {pipeline_mode = #tpu.pipeline_mode<synchronous>, transform_indices = @transform_5, window_bounds = array<i64: 1, 64>}, {pipeline_mode = #tpu.pipeline_mode<synchronous>, transform_indices = @transform_6, window_bounds = array<i64: 1, 64>}, {pipeline_mode = #tpu.pipeline_mode<synchronous>, transform_indices = @transform_7, window_bounds = array<i64: 64, 16>}, {pipeline_mode = #tpu.pipeline_mode<synchronous>, transform_indices = @transform_8, window_bounds = array<i64: 1, 16>}, {transform_indices = @transform_9, window_bounds = array<i64: 8, 16>}]} {
    %c0 = arith.constant 0 : index
    %c0_0 = arith.constant 0 : index
    %0 = vector.load %arg1[%c0, %c0_0] : memref<8x32xbf16, #tpu.memory_space<vmem>>, vector<8x32xbf16>
    %c0_1 = arith.constant 0 : index
    %c0_2 = arith.constant 0 : index
    %1 = vector.load %arg2[%c0_1, %c0_2] : memref<32x64xbf16, #tpu.memory_space<vmem>>, vector<32x64xbf16>
    %cst = arith.constant dense<0.000000e+00> : vector<8x64xf32>
    %2 = tpu.matmul %0, %1, %cst {dimension_numbers = #tpu.dot_dimension_numbers<[1], [0], [0], [1], [0, 0, 1, 1], [], []>} : vector<8x32xbf16>, vector<32x64xbf16>, vector<8x64xf32> -> vector<8x64xf32>
    %c0_3 = arith.constant 0 : index
    %c0_4 = arith.constant 0 : index
    %3 = vector.load %arg3[%c0_3, %c0_4] : memref<1x64xf32, #tpu.memory_space<vmem>>, vector<1x64xf32>
    %4 = vector.broadcast %3 : vector<1x64xf32> to vector<8x64xf32>
    %5 = arith.addf %2, %4 : vector<8x64xf32>
    %cst_5 = arith.constant 0.000000e+00 : f32
    %6 = vector.broadcast %cst_5 : f32 to vector<8x64xf32>
    %7 = arith.maximumf %5, %6 : vector<8x64xf32>
    %8 = arith.truncf %7 : vector<8x64xf32> to vector<8x64xbf16>
    %c0_6 = arith.constant 0 : index
    %c0_7 = arith.constant 0 : index
    %9 = vector.load %arg4[%c0_6, %c0_7] : memref<64x64xbf16, #tpu.memory_space<vmem>>, vector<64x64xbf16>
    %cst_8 = arith.constant dense<0.000000e+00> : vector<8x64xf32>
    %10 = tpu.matmul %8, %9, %cst_8 {dimension_numbers = #tpu.dot_dimension_numbers<[1], [0], [0], [1], [0, 0, 1, 1], [], []>} : vector<8x64xbf16>, vector<64x64xbf16>, vector<8x64xf32> -> vector<8x64xf32>
    %c0_9 = arith.constant 0 : index
    %c0_10 = arith.constant 0 : index
    %11 = vector.load %arg5[%c0_9, %c0_10] : memref<1x64xf32, #tpu.memory_space<vmem>>, vector<1x64xf32>
    %12 = vector.broadcast %11 : vector<1x64xf32> to vector<8x64xf32>
    %13 = arith.addf %10, %12 : vector<8x64xf32>
    %cst_11 = arith.constant dense<0.000000e+00> : vector<8xf32>
    %14 = vector.multi_reduction <add>, %13, %cst_11 [1] : vector<8x64xf32> to vector<8xf32>
    %15 = vector.shape_cast %14 : vector<8xf32> to vector<8x1xf32>
    %cst_12 = arith.constant 6.400000e+01 : f32
    %16 = vector.broadcast %cst_12 : f32 to vector<8x1xf32>
    %17 = arith.divf %15, %16 : vector<8x1xf32>
    %18 = arith.mulf %13, %13 : vector<8x64xf32>
    %cst_13 = arith.constant dense<0.000000e+00> : vector<8xf32>
    %19 = vector.multi_reduction <add>, %18, %cst_13 [1] : vector<8x64xf32> to vector<8xf32>
    %20 = vector.shape_cast %19 : vector<8xf32> to vector<8x1xf32>
    %cst_14 = arith.constant 6.400000e+01 : f32
    %21 = vector.broadcast %cst_14 : f32 to vector<8x1xf32>
    %22 = arith.divf %20, %21 : vector<8x1xf32>
    %23 = arith.mulf %17, %17 : vector<8x1xf32>
    %24 = arith.subf %22, %23 : vector<8x1xf32>
    %cst_15 = arith.constant 0.000000e+00 : f32
    %25 = vector.broadcast %cst_15 : f32 to vector<8x1xf32>
    %26 = arith.maximumf %24, %25 : vector<8x1xf32>
    %27 = vector.broadcast %17 : vector<8x1xf32> to vector<8x64xf32>
    %28 = arith.subf %13, %27 : vector<8x64xf32>
    %cst_16 = arith.constant 9.99999974E-6 : f32
    %29 = vector.broadcast %cst_16 : f32 to vector<8x1xf32>
    %30 = arith.addf %26, %29 : vector<8x1xf32>
    %31 = math.rsqrt %30 : vector<8x1xf32>
    %32 = vector.broadcast %31 : vector<8x1xf32> to vector<8x64xf32>
    %33 = arith.mulf %28, %32 : vector<8x64xf32>
    %c0_17 = arith.constant 0 : index
    %c0_18 = arith.constant 0 : index
    %34 = vector.load %arg6[%c0_17, %c0_18] : memref<1x64xf32, #tpu.memory_space<vmem>>, vector<1x64xf32>
    %35 = vector.broadcast %34 : vector<1x64xf32> to vector<8x64xf32>
    %36 = arith.mulf %33, %35 : vector<8x64xf32>
    %c0_19 = arith.constant 0 : index
    %c0_20 = arith.constant 0 : index
    %37 = vector.load %arg7[%c0_19, %c0_20] : memref<1x64xf32, #tpu.memory_space<vmem>>, vector<1x64xf32>
    %38 = vector.broadcast %37 : vector<1x64xf32> to vector<8x64xf32>
    %39 = arith.addf %36, %38 : vector<8x64xf32>
    %40 = arith.truncf %39 : vector<8x64xf32> to vector<8x64xbf16>
    %41 = math.tanh %40 : vector<8x64xbf16>
    %c0_21 = arith.constant 0 : index
    %c0_22 = arith.constant 0 : index
    %42 = vector.load %arg8[%c0_21, %c0_22] : memref<64x16xbf16, #tpu.memory_space<vmem>>, vector<64x16xbf16>
    %cst_23 = arith.constant dense<0.000000e+00> : vector<8x16xf32>
    %43 = tpu.matmul %41, %42, %cst_23 {dimension_numbers = #tpu.dot_dimension_numbers<[1], [0], [0], [1], [0, 0, 1, 1], [], []>} : vector<8x64xbf16>, vector<64x16xbf16>, vector<8x16xf32> -> vector<8x16xf32>
    %c0_24 = arith.constant 0 : index
    %c0_25 = arith.constant 0 : index
    %44 = vector.load %arg9[%c0_24, %c0_25] : memref<1x16xf32, #tpu.memory_space<vmem>>, vector<1x16xf32>
    %45 = vector.broadcast %44 : vector<1x16xf32> to vector<8x16xf32>
    %46 = arith.addf %43, %45 : vector<8x16xf32>
    %c0_26 = arith.constant 0 : index
    %c0_27 = arith.constant 0 : index
    %47 = vector.load %arg10[%c0_26, %c0_27] : memref<8x16xf32, #tpu.memory_space<vmem>>, vector<8x16xf32>
    tpu.vector_store %arg10[%c0_26, %c0_27], %46 {strides = array<i32>} : memref<8x16xf32, #tpu.memory_space<vmem>>, vector<8x16xf32>,
    return
  }
  func.func @transform_0(%arg0: i32) -> (i32, i32) {
    %c0_i32 = arith.constant 0 : i32
    %c0_i32_0 = arith.constant 0 : i32
    return %arg0, %c0_i32 : i32, i32
  }
  func.func @transform_1(%arg0: i32) -> (i32, i32) {
    %c0_i32 = arith.constant 0 : i32
    %c0_i32_0 = arith.constant 0 : i32
    %c0_i32_1 = arith.constant 0 : i32
    return %c0_i32, %c0_i32_0 : i32, i32
  }
  func.func @transform_2(%arg0: i32) -> (i32, i32) {
    %c0_i32 = arith.constant 0 : i32
    %c0_i32_0 = arith.constant 0 : i32
    %c0_i32_1 = arith.constant 0 : i32
    return %c0_i32, %c0_i32_0 : i32, i32
  }
  func.func @transform_3(%arg0: i32) -> (i32, i32) {
    %c0_i32 = arith.constant 0 : i32
    %c0_i32_0 = arith.constant 0 : i32
    %c0_i32_1 = arith.constant 0 : i32
    return %c0_i32, %c0_i32_0 : i32, i32
  }
  func.func @transform_4(%arg0: i32) -> (i32, i32) {
    %c0_i32 = arith.constant 0 : i32
    %c0_i32_0 = arith.constant 0 : i32
    %c0_i32_1 = arith.constant 0 : i32
    return %c0_i32, %c0_i32_0 : i32, i32
  }
  func.func @transform_5(%arg0: i32) -> (i32, i32) {
    %c0_i32 = arith.constant 0 : i32
    %c0_i32_0 = arith.constant 0 : i32
    %c0_i32_1 = arith.constant 0 : i32
    return %c0_i32, %c0_i32_0 : i32, i32
  }
  func.func @transform_6(%arg0: i32) -> (i32, i32) {
    %c0_i32 = arith.constant 0 : i32
    %c0_i32_0 = arith.constant 0 : i32
    %c0_i32_1 = arith.constant 0 : i32
    return %c0_i32, %c0_i32_0 : i32, i32
  }
  func.func @transform_7(%arg0: i32) -> (i32, i32) {
    %c0_i32 = arith.constant 0 : i32
    %c0_i32_0 = arith.constant 0 : i32
    %c0_i32_1 = arith.constant 0 : i32
    return %c0_i32, %c0_i32_0 : i32, i32
  }
  func.func @transform_8(%arg0: i32) -> (i32, i32) {
    %c0_i32 = arith.constant 0 : i32
    %c0_i32_0 = arith.constant 0 : i32
    %c0_i32_1 = arith.constant 0 : i32
    return %c0_i32, %c0_i32_0 : i32, i32
  }
  func.func @transform_9(%arg0: i32) -> (i32, i32) {
    %c0_i32 = arith.constant 0 : i32
    %c0_i32_0 = arith.constant 0 : i32
    return %arg0, %c0_i32 : i32, i32
  }
}

</mosaic_0001>

<bundles_post_ra>
// kernel: fully_connected_forward.1
= control target key start
LH: loop header
LB: loop body
LE: loop exit
PB: predicated region body
PF: predicated region fallthrough
CT: control target
= control target key end

     0   :  { %s810_s30 = smov 0   ;;  %s883_s0 = inlined_call_operand.vmem [shape: bf16[24,32], index: 0, kind: input, shape index: {}]   ;;  %s884_s1 = inlined_call_operand.vmem [shape: bf16[32,64], index: 1, kind: input, shape index: {}]   ;;  %s885_s2 = inlined_call_operand.vmem [shape: f32[1,64], index: 2, kind: input, shape index: {}]   ;;  %s886_s3 = inlined_call_operand.vmem [shape: bf16[64,64], index: 3, kind: input, shape index: {}]   ;;  %s887_s4 = inlined_call_operand.vmem [shape: f32[1,64], index: 4, kind: input, shape index: {}]   ;;  %s888_s5 = inlined_call_operand.vmem [shape: f32[1,64], index: 5, kind: input, shape index: {}]   ;;  %s889_s6 = inlined_call_operand.vmem [shape: f32[1,64], index: 6, kind: input, shape index: {}]   ;;  %s890_s7 = inlined_call_operand.vmem [shape: bf16[64,16], index: 7, kind: input, shape index: {}]   ;;  %s891_s8 = inlined_call_operand.vmem [shape: f32[1,16], index: 8, kind: input, shape index: {}]   ;;  %s892_s9 = inlined_call_operand.vmem [shape: f32[24,16], index: 9, kind: output, shape index: {}]  }
   0x1 LB: > { %s654_s10 = sadd.s32 4294967295, %s756_s30   ;;  %p658_p0 = scmp.ge.s32.totalorder %s756_s30, 1  ;;  %s756_s30 = sphi %s810_s30, %s19_s30  }
   0x2   : > { %p286_p1 = scmp.lt.s32.totalorder %s756_s30, 4 }
   0x4   : > { %p287_p2 = pnand %p658_p0, %p286_p1 }
   0x5   : > { %p320_p3 = scmp.lt.s32.totalorder (!%p287_p2), %s654_s10, 2 }
   0x6   : > { %290 = sbr.rel (%p287_p2) target bundleno = 801 (0x321), region = 56 }
   0xb   : > { %v736_v0 = vld [vmem:[%s884_s1 + $0x8] sm:$0xff]   ;;  %v758_v1 = vmov 0.0   ;;  %v737_v2 = vld [vmem:[%s884_s1] sm:$0xff]   ;;  %vm759_vm0 = vmmov 0   ;;  %v738_v3 = vld [vmem:[%s886_s3 + $0x18] sm:$0xff]   ;;  %s894_s10 = smov (!%p320_p3, %s654_s10), 2 }
   0xc   : > { %694 = vmatprep.subr.bf16.mxu0 %v758_v1  ;;  %702 = vmatprep.subr.bf16.mxu1 %v758_v1  ;;  %v739_v4 = vld [vmem:[%s886_s3 + $0x10] sm:$0xff]   ;;  %s659_s19 = sshll.u32 %s894_s10, 2  ;;  %vm353_vm1 = vcmask 261120   ;;  %v740_v6 = vld [vmem:[%s886_s3 + $0x8] sm:$0xff]   ;;  %v741_v7 = vld [vmem:[%s886_s3] sm:$0xff]   ;;  %vm438_vm2 = vcmask 523264  }
   0xd   : > { %695 = vmatpush3.bf16.msra.mxu0 %v736_v0  ;;  %698 = vmatprep.mubr.msk.bf16.mxu0 %vm759_vm0, %v758_v1  ;;  %s323_s22 = scalar_lea.vmem %s883_s0, %s659_s19  ;;  %v661_v8 = vld [vmem:[%s885_s2] ss:$0 sm:$0xff]  ;;  %v742_v25 = vld [vmem:[%s890_s7 + $0x18] sm:$0xff]   ;;  %v743_v26 = vld [vmem:[%s890_s7 + $0x10] sm:$0xff]   ;;  %s660_s24 = sshll.u32 %s894_s10, 3  ;;  %vm599_vm3 = vcmask 130048  }
   0xe   : > { %696 = vmatprep.subr.bf16.mxu0 %v758_v1  ;;  %710 = vmatprep.mubr.msk.bf16.mxu1 %vm759_vm0, %v758_v1  ;;  %v329_v5 = vld [vmem:[%s323_s22] sm:$0xf]  ;;  %v744_v27 = vld [vmem:[%s890_s7 + $0x8] sm:$0xff]   ;;  %s327_s29 = scalar_lea.vmem %s892_s9, %s660_s24 }
   0xf   : > { %703 = vmatpush3.bf16.msra.mxu1 %v738_v3  ;;  %v665_v16 = vld [vmem:[%s887_s4] ss:$0 sm:$0xff] }
  0x10   : > { %704 = vmatprep.subr.bf16.mxu1 %v758_v1  ;;  %v745_v28 = vld [vmem:[%s890_s7] sm:$0xff]  }
  0x11   : > { %697 = vmatpush3.bf16.msra.mxu0 %v737_v2  ;;  %v671_v39 = vld [vmem:[%s888_s5] ss:$0 sm:$0xff] }
  0x12   : > { %714 = vmatprep.subr.bf16.mxu0 %v758_v1  ;;  %v672_v41 = vld [vmem:[%s889_s6] ss:$0 sm:$0xff] }
  0x13   : > { %705 = vmatpush3.bf16.msra.mxu1 %v739_v4  ;;  %v673_v46 = vld [vmem:[%s891_s8] ss:$0 sm:$0xff] }
  0x14   : > { %699 = vmatmul.mubr.msk.bf16.vlgmr.msra.gmra.mxu0 %vm353_vm1, %v329_v5  ;;  %706 = vmatprep.subr.bf16.mxu1 %v758_v1 }
  0x15   : > { %722 = vmatprep.mubr.msk.bf16.mxu0 %vm759_vm0, %v758_v1  ;;  %715 = vmatpush3.bf16.msra.mxu0 %v742_v25 }
  0x16   : > { %716 = vmatprep.subr.bf16.mxu0 %v758_v1 }
  0x17   : > { %707 = vmatpush3.bf16.msra.mxu1 %v740_v6 }
  0x18   : > { %708 = vmatprep.subr.bf16.mxu1 %v758_v1 }
  0x19   : > { %717 = vmatpush3.bf16.msra.mxu0 %v743_v26 }
  0x1a   : > { %718 = vmatprep.subr.bf16.mxu0 %v758_v1 }
  0x1b   : > { %709 = vmatpush3.bf16.msra.mxu1 %v741_v7 }
  0x1d   : > { %719 = vmatpush3.bf16.msra.mxu0 %v744_v27 }
  0x1e   : > { %720 = vmatprep.subr.bf16.mxu0 %v758_v1 }
  0x21   : > { %721 = vmatpush3.bf16.msra.mxu0 %v745_v28 }
  0xd4   : > { %v391_v9 = vpop.f32.mrf.mxu0 }
  0xd5   : > { %v392_v10 = vadd.f32 %v661_v8, %v391_v9 }
  0xd6   : > { %v700_v11 = vpop.f32.mrf.mxu0 }
  0xd7   : > { %v397_v12 = vmax.f32 %v392_v10, 0.0 }
  0xd8   : > { %v394_v13 = vpop.f32.mrf.mxu0 }
  0xd9   : > { %v398_v14 = vpack.c.bf16 %v397_v12, %v397_v12 }
  0xda   : > { %v701_v15 = vpop.f32.mrf.mxu0 }
  0xdb   : > { %711 = vmatmul.mubr.msk.bf16.vlgmr.msra.gmra.mxu1 %vm438_vm2, %v398_v14 }
 0x19b   : > { %v476_v17 = vpop.f32.mrf.mxu1 }
 0x19c   : > { %v477_v18 = vadd.f32 %v665_v16, %v476_v17 }
 0x19d   : > { %v712_v19 = vpop.f32.mrf.mxu1 }
 0x19e   : > { %v482_v20 = vsel %vm438_vm2, %v477_v18, 0.0  ;;  %v487_v21 = vmul.f32 %v477_v18, %v477_v18 }
 0x19f   : > { %483 = vadd.xlane.f32.xlu0 %v482_v20  ;;  %v479_v22 = vpop.f32.mrf.mxu1 }
 0x1a0   : > { %v488_v24 = vsel %vm438_vm2, %v487_v21, 0.0 }
 0x1a1   : > { %v713_v23 = vpop.f32.mrf.mxu1 }
 0x1a3   : > { %489 = vadd.xlane.f32.xlu0 %v488_v24 }
 0x228   : > { %v484_v29 = vpop.xlane.xlu0 %483 }
 0x229   : > { %v486_v30 = vmul.f32 0.015625, %v484_v29 }
 0x22b   : > { %v492_v32 = vmul.f32 %v486_v30, %v486_v30  ;;  %v495_v37 = vsub.f32 %v477_v18, %v486_v30 }
 0x22c   : > { %v490_v31 = vpop.xlane.xlu0 %489 }
 0x22d   : > { %v491_v33 = vmul.f32 0.015625, %v490_v31 }
 0x22f   : > { %v493_v34 = vsub.f32 %v491_v33, %v492_v32 }
 0x231   : > { %v494_v35 = vmax.f32 %v493_v34, 0.0 }
 0x233   : > { %v496_v36 = vadd.f32 1e-05, %v494_v35 }
 0x235   : > { %746 = vrsqrt.f32 %v496_v36 }
 0x242   : > { %v747_v38 = vpop.eup %746 }
 0x243   : > { %v498_v40 = vmul.f32 %v747_v38, %v495_v37 }
 0x245   : > { %v506_v42 = vmul.f32 %v671_v39, %v498_v40 }
 0x247   : > { %v514_v43 = vadd.f32 %v672_v41, %v506_v42 }
 0x249   : > { %v515_v44 = vpack.c.bf16 %v514_v43, %v514_v43 }
 0x24b   : > { %748 = vtanh.bf16 %v515_v44 }
 0x259   : > { %v749_v45 = vpop.eup %748 }
 0x25a   : > { %723 = vmatmul.mubr.msk.bf16.vlgmr.msra.gmra.mxu0 %vm438_vm2, %v749_v45 }
 0x31a   : > { %v593_v47 = vpop.f32.mrf.mxu0 }
 0x31b   : > { %v594_v48 = vadd.f32 %v673_v46, %v593_v47 }
 0x31c   : > { %v724_v49 = vpop.f32.mrf.mxu0 }
 0x31d   : > { %600 = vst.msk [vmem:[%s327_s29] sm:$0xff] %vm599_vm3, %v594_v48 }
 0x31e   : > { %v596_v50 = vpop.f32.mrf.mxu0 }
 0x320   : > { %v725_v51 = vpop.f32.mrf.mxu0 }
 0x321 PF: > { %s19_s30 = sadd.s32 1, %s756_s30  }
 0x322   : > { %p16_p4 = scmp.ge.s32.totalorder %s19_s30, 5  }
 0x324   :  { %18 = sbr.rel (!%p16_p4) target bundleno = 1 (0x1), region = 86 }

</bundles_post_ra>
